<compile_context>
chip_gen: v6e
topology: v6e:2x2x1
jax: 0.10.0
libtpu: 0.0.40
codegen_flags: <defaults>
</compile_context>

<pallas_src>
import functools

import jax
import jax.numpy as jnp
from jax import lax
from jax.experimental import pallas as pl
from jax.experimental.pallas import tpu as pltpu


def _round_up(x, m):
    return (x + m - 1) // m * m


def multiview_c_kernel(ids_ref, ctx_ref, emb_tbl_ref, w_ctx_ref, w_emb_ref,
                       b_ref, out_ref):
    f32 = jnp.float32
    bp = ctx_ref.shape[0]
    vocab = emb_tbl_ref.shape[0]

    # Embedding lookup as a one-hot matmul on the MXU.
    # TODO(synk): for large vocabularies keep the embedding table in HBM
    # (memory_space=pl.ANY) and row-gather with scalar-prefetched ids + DMA.
    ids = ids_ref[...]                                             # [Bp, 1] i32
    iota = lax.broadcasted_iota(jnp.int32, (bp, vocab), 1)         # [Bp, V]
    onehot = (iota == ids).astype(f32)
    emb = jnp.dot(onehot, emb_tbl_ref[...],
                  preferred_element_type=f32)                      # [Bp, E]

    # Fused cat((context, emb)) @ W + b with the weight split row-wise,
    # so no concat buffer / partial-lane stores are needed.
    out = (jnp.dot(ctx_ref[...], w_ctx_ref[...], preferred_element_type=f32)
           + jnp.dot(emb, w_emb_ref[...], preferred_element_type=f32)
           + b_ref[...])
    out_ref[...] = out.astype(out_ref.dtype)


def multiview_c_forward(jrnl_variable, context_vectors, params, *, tile_n=128):
    """params: emb [V, E], weight [M, C+E] (PyTorch Linear layout), bias [M]."""
    ctx = context_vectors.astype(jnp.float32)
    B, C = ctx.shape
    emb_tbl = params["emb"].astype(jnp.float32)
    V, E = emb_tbl.shape
    weight = params["weight"].astype(jnp.float32)
    bias = params["bias"].astype(jnp.float32)
    M = weight.shape[0]
    assert weight.shape[1] == C + E, "weight in_features must be C + jrnl_dim"

    ids = jrnl_variable.reshape(B).astype(jnp.int32)

    # Pad batch to 8 sublanes and mesh dim to a multiple of the lane tile.
    Bp = _round_up(max(B, 8), 8)
    Mp = _round_up(M, tile_n)

    ids_p = jnp.zeros((Bp, 1), jnp.int32).at[:B, 0].set(ids)
    ctx_p = jnp.zeros((Bp, C), jnp.float32).at[:B, :].set(ctx)

    wt = weight.T                                                  # [C+E, M]
    w_ctx = jnp.zeros((C, Mp), jnp.float32).at[:, :M].set(wt[:C])
    w_emb = jnp.zeros((E, Mp), jnp.float32).at[:, :M].set(wt[C:])
    b_p = jnp.zeros((1, Mp), jnp.float32).at[0, :M].set(bias)

    grid = (Mp // tile_n,)

    out_p = pl.pallas_call(
        multiview_c_kernel,
        out_shape=jax.ShapeDtypeStruct((Bp, Mp), jnp.float32),
        grid=grid,
        in_specs=[
            pl.BlockSpec((Bp, 1), lambda j: (0, 0)),        # jrnl ids
            pl.BlockSpec((Bp, C), lambda j: (0, 0)),        # context vectors
            pl.BlockSpec((V, E), lambda j: (0, 0)),         # embedding table
            pl.BlockSpec((C, tile_n), lambda j: (0, j)),    # W rows for context
            pl.BlockSpec((E, tile_n), lambda j: (0, j)),    # W rows for embedding
            pl.BlockSpec((1, tile_n), lambda j: (0, j)),    # bias
        ],
        out_specs=pl.BlockSpec((Bp, tile_n), lambda j: (0, j)),
        compiler_params=pltpu.CompilerParams(
            dimension_semantics=("parallel",)),
    )(ids_p, ctx_p, emb_tbl, w_ctx, w_emb, b_p)

    return out_p[:B, :M]


def _reference(jrnl_variable, context_vectors, params):
    emb = params["emb"][jrnl_variable.reshape(-1)]                 # [B, E]
    combined = jnp.concatenate([context_vectors, emb], axis=1)     # [B, C+E]
    return (jnp.dot(combined, params["weight"].T,
                    precision=lax.Precision.HIGHEST)
            + params["bias"])


if __name__ == "__main__":
    key = jax.random.PRNGKey(0)
    # Module hyper-parameters (small, consistent with the forward pass).
    n_jrnl, jrnl_dim = 32, 16
    hidden_size, n_probes = 32, 4
    mesh_size = 256
    B = 2
    C = hidden_size * n_probes                                     # 128

    k1, k2, k3, k4, k5 = jax.random.split(key, 5)
    bound = 1.0 / (C + jrnl_dim) ** 0.5
    params = dict(
        emb=jax.random.normal(k1, (n_jrnl, jrnl_dim), jnp.float32),
        weight=jax.random.uniform(k2, (mesh_size, C + jrnl_dim),
                                  jnp.float32, -bound, bound),
        bias=jax.random.uniform(k3, (mesh_size,), jnp.float32, -bound, bound),
    )
    jrnl_variable = jax.random.randint(k4, (B, 1), 0, n_jrnl, dtype=jnp.int32)
    context_vectors = jax.random.normal(k5, (B, C), jnp.float32)

    out = multiview_c_forward(jrnl_variable, context_vectors, params)
    jax.block_until_ready(out)

    assert out.shape == (B, mesh_size)
    ref = _reference(jrnl_variable, context_vectors, params)
    assert jnp.allclose(out, ref, rtol=2e-3, atol=2e-3), "mismatch vs reference"
    print("KERNEL_OK")
</pallas_src>

<mosaic_0001>
module attributes {stable_mosaic.version = 11 : i64} {
  func.func @multiview_c_kernel(%arg0: i32, %arg1: memref<8x1xi32, #tpu.memory_space<vmem>>, %arg2: memref<8x128xf32, #tpu.memory_space<vmem>>, %arg3: memref<32x16xf32, #tpu.memory_space<vmem>>, %arg4: memref<128x128xf32, #tpu.memory_space<vmem>>, %arg5: memref<16x128xf32, #tpu.memory_space<vmem>>, %arg6: memref<1x128xf32, #tpu.memory_space<vmem>>, %arg7: memref<8x128xf32, #tpu.memory_space<vmem>>) attributes {dimension_semantics = [#tpu.dimension_semantics<parallel>], iteration_bounds = array<i64: 2>, scalar_prefetch = 0 : i64, scratch_operands = 0 : i64, tpu.core_type = #tpu.core_type<tc>, window_params = [{pipeline_mode = #tpu.pipeline_mode<synchronous>, transform_indices = @transform_0, window_bounds = array<i64: 8, 1>}, {pipeline_mode = #tpu.pipeline_mode<synchronous>, transform_indices = @transform_1, window_bounds = array<i64: 8, 128>}, {pipeline_mode = #tpu.pipeline_mode<synchronous>, transform_indices = @transform_2, window_bounds = array<i64: 32, 16>}, {transform_indices = @transform_3, window_bounds = array<i64: 128, 128>}, {transform_indices = @transform_4, window_bounds = array<i64: 16, 128>}, {transform_indices = @transform_5, window_bounds = array<i64: 1, 128>}, {transform_indices = @transform_6, window_bounds = array<i64: 8, 128>}]} {
    %c0 = arith.constant 0 : index
    %c0_0 = arith.constant 0 : index
    %0 = vector.load %arg1[%c0, %c0_0] : memref<8x1xi32, #tpu.memory_space<vmem>>, vector<8x1xi32>
    %1 = tpu.iota {dimensions = array<i32: 1>} : vector<8x32xi32>
    %2 = vector.broadcast %0 : vector<8x1xi32> to vector<8x32xi32>
    %3 = arith.cmpi eq, %1, %2 : vector<8x32xi32>
    %4 = arith.extui %3 : vector<8x32xi1> to vector<8x32xi32>
    %5 = arith.sitofp %4 : vector<8x32xi32> to vector<8x32xf32>
    %c0_1 = arith.constant 0 : index
    %c0_2 = arith.constant 0 : index
    %6 = vector.load %arg3[%c0_1, %c0_2] : memref<32x16xf32, #tpu.memory_space<vmem>>, vector<32x16xf32>
    %cst = arith.constant dense<0.000000e+00> : vector<8x16xf32>
    %7 = tpu.matmul %5, %6, %cst {dimension_numbers = #tpu.dot_dimension_numbers<[1], [0], [0], [1], [0, 0, 1, 1], [], []>} : vector<8x32xf32>, vector<32x16xf32>, vector<8x16xf32> -> vector<8x16xf32>
    %c0_3 = arith.constant 0 : index
    %c0_4 = arith.constant 0 : index
    %8 = vector.load %arg2[%c0_3, %c0_4] : memref<8x128xf32, #tpu.memory_space<vmem>>, vector<8x128xf32>
    %c0_5 = arith.constant 0 : index
    %c0_6 = arith.constant 0 : index
    %9 = vector.load %arg4[%c0_5, %c0_6] : memref<128x128xf32, #tpu.memory_space<vmem>>, vector<128x128xf32>
    %cst_7 = arith.constant dense<0.000000e+00> : vector<8x128xf32>
    %10 = tpu.matmul %8, %9, %cst_7 {dimension_numbers = #tpu.dot_dimension_numbers<[1], [0], [0], [1], [0, 0, 1, 1], [], []>} : vector<8x128xf32>, vector<128x128xf32>, vector<8x128xf32> -> vector<8x128xf32>
    %c0_8 = arith.constant 0 : index
    %c0_9 = arith.constant 0 : index
    %11 = vector.load %arg5[%c0_8, %c0_9] : memref<16x128xf32, #tpu.memory_space<vmem>>, vector<16x128xf32>
    %cst_10 = arith.constant dense<0.000000e+00> : vector<8x128xf32>
    %12 = tpu.matmul %7, %11, %cst_10 {dimension_numbers = #tpu.dot_dimension_numbers<[1], [0], [0], [1], [0, 0, 1, 1], [], []>} : vector<8x16xf32>, vector<16x128xf32>, vector<8x128xf32> -> vector<8x128xf32>
    %13 = arith.addf %10, %12 : vector<8x128xf32>
    %c0_11 = arith.constant 0 : index
    %c0_12 = arith.constant 0 : index
    %14 = vector.load %arg6[%c0_11, %c0_12] : memref<1x128xf32, #tpu.memory_space<vmem>>, vector<1x128xf32>
    %15 = vector.broadcast %14 : vector<1x128xf32> to vector<8x128xf32>
    %16 = arith.addf %13, %15 : vector<8x128xf32>
    %c0_13 = arith.constant 0 : index
    %c0_14 = arith.constant 0 : index
    %17 = vector.load %arg7[%c0_13, %c0_14] : memref<8x128xf32, #tpu.memory_space<vmem>>, vector<8x128xf32>
    tpu.vector_store %arg7[%c0_13, %c0_14], %16 {strides = array<i32>} : memref<8x128xf32, #tpu.memory_space<vmem>>, vector<8x128xf32>,
    return
  }
  func.func @transform_0(%arg0: i32) -> (i32, i32) {
    %c0_i32 = arith.constant 0 : i32
    %c0_i32_0 = arith.constant 0 : i32
    %c0_i32_1 = arith.constant 0 : i32
    return %c0_i32, %c0_i32_0 : i32, i32
  }
  func.func @transform_1(%arg0: i32) -> (i32, i32) {
    %c0_i32 = arith.constant 0 : i32
    %c0_i32_0 = arith.constant 0 : i32
    %c0_i32_1 = arith.constant 0 : i32
    return %c0_i32, %c0_i32_0 : i32, i32
  }
  func.func @transform_2(%arg0: i32) -> (i32, i32) {
    %c0_i32 = arith.constant 0 : i32
    %c0_i32_0 = arith.constant 0 : i32
    %c0_i32_1 = arith.constant 0 : i32
    return %c0_i32, %c0_i32_0 : i32, i32
  }
  func.func @transform_3(%arg0: i32) -> (i32, i32) {
    %c0_i32 = arith.constant 0 : i32
    %c0_i32_0 = arith.constant 0 : i32
    return %c0_i32, %arg0 : i32, i32
  }
  func.func @transform_4(%arg0: i32) -> (i32, i32) {
    %c0_i32 = arith.constant 0 : i32
    %c0_i32_0 = arith.constant 0 : i32
    return %c0_i32, %arg0 : i32, i32
  }
  func.func @transform_5(%arg0: i32) -> (i32, i32) {
    %c0_i32 = arith.constant 0 : i32
    %c0_i32_0 = arith.constant 0 : i32
    return %c0_i32, %arg0 : i32, i32
  }
  func.func @transform_6(%arg0: i32) -> (i32, i32) {
    %c0_i32 = arith.constant 0 : i32
    %c0_i32_0 = arith.constant 0 : i32
    return %c0_i32, %arg0 : i32, i32
  }
}

</mosaic_0001>

<bundles_post_ra>
// kernel: tpu_custom_call.1
= control target key start
LH: loop header
LB: loop body
LE: loop exit
PB: predicated region body
PF: predicated region fallthrough
CT: control target
= control target key end

     0   :  { %11 = vsyncpa [#allocation3], 0  ;;  %s1211_s0 = inlined_call_operand.vmem [shape: s32[8,1], index: 0, kind: input, shape index: {}]   ;;  %s1212_s1 = inlined_call_operand.vmem [shape: f32[8,128], index: 1, kind: input, shape index: {}]   ;;  %s1213_s2 = inlined_call_operand.vmem [shape: f32[32,16], index: 2, kind: input, shape index: {}]   ;;  %s1214_s3 = inlined_call_operand.hbm [shape: f32[128,256], index: 3, kind: input, shape index: {}]   ;;  %s1215_s4 = inlined_call_operand.vmem [shape: f32[16,256], index: 4, kind: input, shape index: {}]   ;;  %s1216_s5 = inlined_call_operand.vmem [shape: f32[1,256], index: 5, kind: input, shape index: {}]   ;;  %s1217_s6 = inlined_call_operand.hbm [shape: f32[8,256], index: 6, kind: output, shape index: {}]  }
   0x1   :  { %13 = vsyncpa [#allocation3 + $0x1], 0 }
   0x2   :  { %14 = vsyncpa [#allocation4], 0 }
   0x3   :  { %16 = vsyncpa [#allocation4 + $0x1], 0  ;;  %s992_s21 = smov 0   ;;  %s994_s22 = smov 0  }
   0x4   :  { %s996_s23 = smov 0   ;;  %s998_s24 = smov 0  }
   0x5 LB: > { %s1013_s25 = sadd.s32 4294967295, %s947_s24   ;;  %s712_s26 = sadd.s32 4294967294, %s947_s24   ;;  %s947_s24 = sphi %s998_s24, %s1230_s24   ;;  %s943_s23 = sphi %s996_s23, %s1229_s23   ;;  %s939_s22 = sphi %s994_s22, %s1228_s22   ;;  %s935_s21 = sphi %s992_s21, %s1227_s21  }
   0x6   : > { %s1017_s27 = sadd.s32 1, %s947_s24   ;;  %s92_s28 = sadd.s32 1, %s943_s23 }
   0x7   : > { %s89_s29 = ssub.s32 %s947_s24, %s1017_s27  ;;  %p99_p0 = scmp.ne.s32.totalorder %s943_s23, %s939_s22 }
   0x8   : > { %p90_p1 = scmp.eq.s32.totalorder %s89_s29, 0  ;;  %p100_p2 = scmp.eq.s32.totalorder %s947_s24, 0 }
   0x9   : > { %p105_p3 = scmp.ne.s32.totalorder %s939_s22, %s935_s21  ;;  %p106_p4 = scmp.eq.s32.totalorder %s1013_s25, 0 }
   0xa   : > { %s1029_s30 = scalar_select %p90_p1, %s943_s23, %s92_s28  }
   0xb   : > { %p1031_p5 = por %p100_p2, %p99_p0  ;;  %p1035_p6 = por %p106_p4, %p105_p3 }
   0xc   : > { %p181_p7 = scmp.eq.s32.totalorder %s1013_s25, 1  ;;  %p187_p8 = scmp.eq.s32.totalorder %s712_s26, 1 }
   0xd   : > { %p1218_p11 = scmp.ge.s32.totalorder %s947_s24, 2 }
   0xe   : > { %p1040_p9 = por %p181_p7, %p99_p0  ;;  %p1044_p10 = por %p187_p8, %p105_p3 }
   0xf   : > { %212 = sbr.rel (%p1218_p11) target bundleno = 48 (0x30), region = 28  ;;  %s1052_s11 = sand.u32 (!%p1218_p11), 1, %s943_s23  }
  0x10   : > { %s1222_s9 = scalar_select %p1040_p9, 1, 0 }
  0x11   : > { %s1223_s10 = scalar_select %p1044_p10, 1, 0 }
  0x12   : > { %s716_s12 = sshll.u32 (!%p1218_p11), %s947_s24, 7  ;;  %s715_s13 = sshll.u32 (!%p1218_p11), %s1052_s11, 7 }
  0x13   : > { %s1059_s16 = scalar_lea.hbm (!%p1218_p11), %s1214_s3, %s716_s12  ;;  %s220_s17 = scalar_lea.vmem (!%p1218_p11), [#allocation2], %s715_s13 }
  0x14   : > { %s226_s18 = sshll.u32 %s220_s17, 4  ;;  %s217_s19 = scalar_lea.sflag [#allocation3], %s1052_s11  ;;  %s1061_s18 = int_to_ptr.vmem [resolvable:$true] %s226_s18 }
  0x15   : > { %s857_s20 = scalar_lea.hbm %s1059_s16, 2048  ;;  %s861_s29 = scalar_lea.hbm %s1214_s3, 4096 }
  0x16   : > { %p858_p12 = scmp.ne.s32.totalorder %s1059_s16, %s857_s20  ;;  %p862_p1 = scmp.lt.s32.totalorder %s1059_s16, %s1214_s3 }
  0x17   : > { %p863_p2 = scmp.lt.s32.totalorder %s861_s29, %s857_s20 }
  0x18   : > { %p859_p13 = pnand %p858_p12, %p1031_p5 }
  0x19   : > { %p864_p3 = por %p863_p2, %p862_p1 }
  0x1a   : > { %p860_p0 = pneg %p859_p13 }
  0x1c   : > { %p865_p4 = pnand %p864_p3, %p860_p0 }
  0x1e   : > { %868 = shalt.err (!%p865_p4)
}
  0x1f   : > { %s869_s13 = scalar_lea.vmem %s1061_s18, 2048  ;;  %s949_s15 = smov [#allocation2]  }
  0x20   : > { %p870_p7 = scmp.ne.s32.totalorder %s1061_s18, %s869_s13  ;;  %s873_s17 = sshll.u32 %s949_s15, 4  ;;  %s874_s17 = int_to_ptr.vmem [resolvable:$false] %s873_s17 }
  0x21   : > { %s875_s26 = scalar_lea.vmem %s874_s17, 4096  ;;  %p876_p13 = scmp.lt.s32.totalorder %s1061_s18, %s874_s17 }
  0x22   : > { %p871_p8 = pnand %p870_p7, %p1031_p5  ;;  %p877_p11 = scmp.lt.s32.totalorder %s875_s26, %s869_s13 }
  0x24   : > { %p872_p12 = pneg %p871_p8  ;;  %p878_p10 = por %p877_p11, %p876_p13 }
  0x26   : > { %p879_p9 = pnand %p878_p10, %p872_p12 }
  0x28   : > { %882 = shalt.err (!%p879_p9)
}
  0x29   : > { %s950_s20 = smov 256   ;;  %s951_s28 = smov 128  }
  0x2a   : > { %s952_s29 = smov 8   ;;  %235 = sbr.rel (!%p1031_p5) target bundleno = 48 (0x30), region = 36 }
  0x2b   : > { %809 = dma.hbm_to_vmem [thread:$0]  (%p1031_p5), %s1059_s16, 2048, %s1061_s18, %s217_s19, %s950_s20, %s951_s28, %s952_s29  }
  0x2c   : > { %s717_s14 = sshll.u32 (%p1031_p5), %s1052_s11, 4  ;;  %s718_s12 = sshll.u32 (%p1031_p5), %s947_s24, 3 }
  0x2d   : > { %s241_s17 = scalar_lea.vmem (%p1031_p5), %s1215_s4, %s718_s12  ;;  %s239_s26 = scalar_lea.vmem (%p1031_p5), [#allocation5], %s717_s14 }
  0x2e   : > { %v272_v0 = vld [vmem:[%s241_s17] sm:$0xff] (%p1031_p5)  ;;  %v274_v1 = vld [vmem:[%s241_s17 + $0x10] sm:$0xff] (%p1031_p5) }
  0x2f   : > { %273 = vst [vmem:[%s239_s26] sm:$0xff] %v272_v0  ;;  %275 = vst [vmem:[%s239_s26 + $0x8] sm:$0xff] %v274_v1 }
  0x30 PF: > { %p719_p9 = scmp.ge.s32.totalorder %s947_s24, 1  ;;  %p286_p10 = scmp.lt.s32.totalorder %s947_s24, 3 }
  0x32   : > { %p287_p5 = pnand %p719_p9, %p286_p10 }
  0x33   : > { %s1096_s7 = sand.u32 (!%p287_p5), 1, %s939_s22  }
  0x34   : > { %290 = sbr.rel (%p287_p5) target bundleno = 590 (0x24e), region = 78  ;;  %s720_s11 = sshll.u32 (!%p287_p5), %s1096_s7, 7 }
  0x35   : > { %s293_s16 = scalar_lea.sflag (!%p287_p5), [#allocation3], %s1096_s7  ;;  %s1100_s18 = scalar_lea.vmem (!%p287_p5), [#allocation2], %s720_s11 }
  0x39   : > { %926 = dma.done.wait (%p1035_p6), %s293_s16, 2048  }
  0x3a   : > { %928 = vsyncadd (%p1035_p6), %s293_s16, 4294965248  ;;  %v953_v2 = vmov 0   ;;  %v954_v3 = vmov 0.0   ;;  %vm955_vm0 = vmmov 0   ;;  %v342_v4 = vld [vmem:[%s1211_s0] sm:$0xff]  ;;  %v354_v5 = vld [vmem:[%s1213_s2 + $0x18] sm:$0xff]  ;;  %v343_v26 = vlaneseq }
  0x3b   : > { %856 = vset.pattern.permute.xlu0 %v953_v2  ;;  %756 = vmatprep.subr.mxu0 %v954_v3  ;;  %v353_v6 = vld [vmem:[%s1213_s2 + $0x10] sm:$0xff]  ;;  %v445_v7 = vld [vmem:[%s1100_s18 + $0x78] sm:$0xff]  ;;  %v352_v8 = vld [vmem:[%s1213_s2 + $0x8] sm:$0xff]  ;;  %s721_s16 = sshll.u32 %s1096_s7, 4  ;;  %vm355_vm1 = vcmask 261120   ;;  %vm448_vm3 = vcmask 130048  }
  0x3c   : > { %774 = vmatprep.subr.mxu1 %v954_v3  ;;  %764 = vmatprep.mubr.msk.f32.mxu0 %vm955_vm0, %v954_v3  ;;  %v444_v9 = vld [vmem:[%s1100_s18 + $0x70] sm:$0xff]  ;;  %v443_v10 = vld [vmem:[%s1100_s18 + $0x68] sm:$0xff]  ;;  %v351_v11 = vld [vmem:[%s1213_s2] sm:$0xff]  ;;  %v344_v27 = vand.u32 127, %v343_v26  ;;  %s304_s19 = scalar_lea.vmem [#allocation5], %s721_s16  ;;  %p339_p6 = scmp.lt.s32.totalorder %s1013_s25, 1 }
  0x3d   : > { %806 = vmatprep.mubr.msk.f32.mxu1 %vm955_vm0, %v954_v3  ;;  %346 = vperm.xlu0 %856, %v342_v4   ;;  %v442_v12 = vld [vmem:[%s1100_s18 + $0x60] sm:$0xff]  ;;  %v441_v13 = vld [vmem:[%s1100_s18 + $0x58] sm:$0xff]  ;;  %v440_v14 = vld [vmem:[%s1100_s18 + $0x50] sm:$0xff]  ;;  %s722_s8 = sshll.u32 %s1096_s7, 3  ;;  %s728_s14 = sshll.u32 %s1013_s25, 7 }
  0x3e   : > { %757 = vmatpush3.msra.mxu0 %v354_v5  ;;  %775 = vmatpush3.msra.mxu1 %v445_v7  ;;  %v439_v15 = vld [vmem:[%s1100_s18 + $0x48] sm:$0xff]  ;;  %v438_v16 = vld [vmem:[%s1100_s18 + $0x40] sm:$0xff]  ;;  %v437_v17 = vld [vmem:[%s1100_s18 + $0x38] sm:$0xff]  ;;  %s338_s12 = scalar_lea.vmem [#allocation6], %s722_s8  ;;  %s613_s26 = scalar_lea.hbm %s1217_s6, %s728_s14 }
  0x3f   : > { %758 = vmatprep.subr.mxu0 %v954_v3  ;;  %776 = vmatprep.subr.mxu1 %v954_v3  ;;  %v436_v18 = vld [vmem:[%s1100_s18 + $0x30] sm:$0xff]  ;;  %v435_v19 = vld [vmem:[%s1100_s18 + $0x28] sm:$0xff]  ;;  %v434_v20 = vld [vmem:[%s1100_s18 + $0x20] sm:$0xff]  ;;  %s615_s13 = sshll.u32 %s338_s12, 4  ;;  %s602_s11 = scalar_lea.sflag [#allocation4], %s1096_s7  ;;  %s616_s13 = int_to_ptr.vmem [resolvable:$true] %s615_s13 }
  0x40   : > { %759 = vmatpush3.msra.mxu0 %v353_v6  ;;  %777 = vmatpush3.msra.mxu1 %v444_v9  ;;  %v433_v21 = vld [vmem:[%s1100_s18 + $0x18] sm:$0xff]  ;;  %v432_v22 = vld [vmem:[%s1100_s18 + $0x10] sm:$0xff]  ;;  %v431_v23 = vld [vmem:[%s1100_s18 + $0x8] sm:$0xff]  ;;  %s883_s16 = scalar_lea.vmem %s616_s13, 128  ;;  %p1224_p0 = scmp.ne.s32.totalorder %s1222_s9, 0 }
  0x41   : > { %760 = vmatprep.subr.mxu0 %v954_v3  ;;  %778 = vmatprep.subr.mxu1 %v954_v3  ;;  %v430_v24 = vld [vmem:[%s1100_s18] sm:$0xff]  ;;  %v447_v29 = vld [vmem:[%s304_s19 + $0x8] sm:$0xff]  ;;  %s340_s18 = scalar_select %p339_p6, %s1013_s25, 1 }
  0x42   : > { %761 = vmatpush3.msra.mxu0 %v352_v8  ;;  %779 = vmatpush3.msra.mxu1 %v443_v10  ;;  %v429_v25 = vld [vmem:[%s1212_s1] sm:$0xff]  ;;  %p884_p11 = scmp.ne.s32.totalorder %s616_s13, %s883_s16 }
  0x43   : > { %762 = vmatprep.subr.mxu0 %v954_v3  ;;  %780 = vmatprep.subr.mxu1 %v954_v3  ;;  %v446_v31 = vld [vmem:[%s304_s19] sm:$0xff]  ;;  %s341_s29 = scalar_lea.vmem %s1216_s5, %s340_s18  ;;  %s956_s19 = smov [#allocation6]  }
  0x44   : > { %763 = vmatpush3.msra.mxu0 %v351_v11  ;;  %781 = vmatpush3.msra.mxu1 %v442_v12  ;;  %v726_v37 = vld [vmem:[%s341_s29] ss:$0 sm:$0xff]  ;;  %p885_p1 = pnand %p884_p11, %p1224_p0  ;;  %s887_s18 = sshll.u32 %s956_s19, 4  ;;  %s888_s18 = int_to_ptr.vmem [resolvable:$false] %s887_s18 }
  0x45   : > { %767 = vmatprep.subr.mxu0 %v954_v3  ;;  %782 = vmatprep.subr.mxu1 %v954_v3  ;;  %s889_s25 = scalar_lea.vmem %s888_s18, 256  ;;  %p890_p3 = scmp.lt.s32.totalorder %s616_s13, %s888_s18 }
  0x46   : > { %783 = vmatpush3.msra.mxu1 %v441_v13  ;;  %p886_p2 = pneg %p885_p1  ;;  %p891_p4 = scmp.lt.s32.totalorder %s889_s25, %s883_s16 }
  0x47   : > { %784 = vmatprep.subr.mxu1 %v954_v3 }
  0x48   : > { %785 = vmatpush3.msra.mxu1 %v440_v14  ;;  %p892_p7 = por %p891_p4, %p890_p3 }
  0x49   : > { %786 = vmatprep.subr.mxu1 %v954_v3 }
  0x4a   : > { %787 = vmatpush3.msra.mxu1 %v439_v15  ;;  %p893_p8 = pnand %p892_p7, %p886_p2 }
  0x4b   : > { %788 = vmatprep.subr.mxu1 %v954_v3 }
  0x4c   : > { %789 = vmatpush3.msra.mxu1 %v438_v16 }
  0x4d   : > { %790 = vmatprep.subr.mxu1 %v954_v3 }
  0x4e   : > { %791 = vmatpush3.msra.mxu1 %v437_v17 }
  0x4f   : > { %792 = vmatprep.subr.mxu1 %v954_v3 }
  0x50   : > { %793 = vmatpush3.msra.mxu1 %v436_v18 }
  0x51   : > { %794 = vmatprep.subr.mxu1 %v954_v3 }
  0x52   : > { %795 = vmatpush3.msra.mxu1 %v435_v19 }
  0x53   : > { %796 = vmatprep.subr.mxu1 %v954_v3 }
  0x54   : > { %797 = vmatpush3.msra.mxu1 %v434_v20 }
  0x55   : > { %798 = vmatprep.subr.mxu1 %v954_v3 }
  0x56   : > { %799 = vmatpush3.msra.mxu1 %v433_v21 }
  0x57   : > { %800 = vmatprep.subr.mxu1 %v954_v3 }
  0x58   : > { %801 = vmatpush3.msra.mxu1 %v432_v22 }
  0x59   : > { %802 = vmatprep.subr.mxu1 %v954_v3 }
  0x5a   : > { %803 = vmatpush3.msra.mxu1 %v431_v23 }
  0x5b   : > { %804 = vmatprep.subr.mxu1 %v954_v3 }
  0x5c   : > { %805 = vmatpush3.msra.mxu1 %v430_v24 }
  0x5d   : > { %807 = vmatmul.mubr.f32.vlgmr.msra.gmra.mxu1 %v429_v25 }
  0xb8   : > { %v347_v28 = vpop.permute.xlu0 %346 }
  0xb9   : > { %vm348_vm2 = vcmp.eq.s32.totalorder %v344_v27, %v347_v28 }
  0xba   : > { %v723_v30 = vsel %vm348_vm2, 1.0, %v954_v3 }
  0xbb   : > { %765 = vmatmul.mubr.msk.f32.vlgmr.msra.gmra.mxu0 %vm355_vm1, %v723_v30 }
  0xbc   : > { %768 = vmatpush3.msra.mxu0 %v447_v29  ;;  %771 = vmatprep.mubr.msk.f32.mxu0 %vm955_vm0, %v954_v3 }
  0xbd   : > { %769 = vmatprep.subr.mxu0 %v954_v3 }
  0xbe   : > { %770 = vmatpush3.msra.mxu0 %v446_v31 }
 0x11d   : > { %v588_v32 = vpop.f32.mrf.mxu1 }
 0x11f   : > { %v808_v33 = vpop.f32.mrf.mxu1 }
 0x17b   : > { %v425_v34 = vpop.f32.mrf.mxu0 }
 0x17c   : > { %772 = vmatmul.mubr.msk.f32.vlgmr.msra.gmra.mxu0 %vm448_vm3, %v425_v34 }
 0x17d   : > { %v766_v35 = vpop.f32.mrf.mxu0 }
 0x23c   : > { %v518_v36 = vpop.f32.mrf.mxu0 }
 0x23d   : > { %v589_v38 = vadd.f32 %v588_v32, %v518_v36 }
 0x23e   : > { %v773_v39 = vpop.f32.mrf.mxu0 }
 0x23f   : > { %v599_v40 = vadd.f32 %v726_v37, %v589_v38 }
 0x241   : > { %600 = vst [vmem:[%s338_s12] sm:$0xff] %v599_v40 }
 0x242   : > { %896 = shalt.err (!%p893_p8)
}
 0x243   : > { %s897_s8 = scalar_lea.hbm %s613_s26, 128  ;;  %s901_s28 = scalar_lea.hbm %s1217_s6, 256 }
 0x244   : > { %p898_p12 = scmp.ne.s32.totalorder %s613_s26, %s897_s8  ;;  %p902_p10 = scmp.lt.s32.totalorder %s613_s26, %s1217_s6 }
 0x245   : > { %p903_p5 = scmp.lt.s32.totalorder %s901_s28, %s897_s8 }
 0x246   : > { %p899_p13 = pnand %p898_p12, %p1224_p0 }
 0x247   : > { %p904_p6 = por %p903_p5, %p902_p10 }
 0x248   : > { %p900_p9 = pneg %p899_p13 }
 0x24a   : > { %p905_p11 = pnand %p904_p6, %p900_p9 }
 0x24c   : > { %908 = shalt.err (!%p905_p11)
}
 0x24d   : > { %811 = dma.vmem_to_hbm [thread:$0]  (%p1224_p0), %s616_s13, 128, %s613_s26, %s602_s11  }
 0x24e PF: > { %s627_s12 = sand.u32 1, %s935_s21   ;;  %p1225_p1 = scmp.ne.s32.totalorder %s1223_s10, 0 }
 0x24f   : > { %p1226_p2 = scmp.ge.s32.totalorder %s947_s24, 2  ;;  %s628_s15 = scalar_lea.sflag [#allocation4], %s627_s12 }
 0x251   : > { %p814_p3 = pnand %p1226_p2, %p1225_p1 }
 0x253   : > { %p815_p4 = pneg %p814_p3 }
 0x255   : > { %930 = dma.done.wait (%p815_p4), %s628_s15, 128  }
 0x256   : > { %932 = vsyncadd (%p815_p4), %s628_s15, 4294967168  ;;  %p19_p7 = scmp.ge.s32.totalorder %s1017_s27, 4   ;;  %s1227_s21 = smov %s939_s22 }
 0x257   : > { %s1228_s22 = smov %s943_s23  ;;  %s1229_s23 = smov %s1029_s30 }
 0x258   : > { %s1230_s24 = smov %s1017_s27  ;;  %21 = sbr.rel (!%p19_p7) target bundleno = 5 (0x5), region = 138 }
 0x25d   :  { %633 = vsyncpa [#allocation3], 1 }
 0x25e   :  { %635 = vsyncpa [#allocation3 + $0x1], 1 }
 0x25f   :  { %636 = vsyncpa [#allocation4], 1 }
 0x260   :  { %638 = vsyncpa [#allocation4 + $0x1], 1 }

</bundles_post_ra>
